<compile_context>
chip_gen: v7x
topology: tpu7x:2x2x1
jax: 0.10.0
libtpu: 0.0.40
codegen_flags: <defaults>
</compile_context>

<pallas_src>
import jax
import jax.numpy as jnp
from jax.experimental import pallas as pl
from jax.experimental.pallas import tpu as pltpu


# --------------------------------------------------------------------------
# Fused encoder + linear classifier
# --------------------------------------------------------------------------
def classifier_forward(x, wc, bc, wl, bl):
    """x: [B, C, H, W] float32 (NCHW). Returns logits [B, num_classes] f32."""
    B, C, H, W = x.shape
    C_out = wc.shape[0]
    num_classes = wl.shape[0]
    KH, KW = wc.shape[2], wc.shape[3]
    assert (KH, KW) == (3, 3)

    NC_PAD = 128                     # lane-padded classifier output width
    K_IN = (W + 2) * C               # contraction dim of each row-shift matmul
    N_WIDE = W * C_out               # conv output per image row: (w, c_out) on lanes
    N_TILE = 128                     # lane-dense conv-output tile (reduction grid axis)
    assert N_WIDE % N_TILE == 0 and N_TILE % C_out == 0
    n_tiles = N_WIDE // N_TILE
    assert num_classes <= NC_PAD

    # ---------------- wrapper-side (one-time) layout / parameter prep ----------------
    # NCHW -> NHWC, zero-pad spatially by 1, fold (w, c) into the lane dim, cast bf16.
    x_nhwc = jnp.transpose(x, (0, 2, 3, 1))                       # [B, H, W, C]
    x_pad = jnp.pad(x_nhwc, ((0, 0), (1, 1), (1, 1), (0, 0)))     # [B, H+2, W+2, C]
    x_flat = x_pad.reshape(B, H + 2, K_IN).astype(jnp.bfloat16)   # [B, H+2, (W+2)*C]

    # Row-shift block-Toeplitz conv weights:
    #   w_taps[di, wcol*C + c, w*C_out + co] = wc[co, c, di, wcol - w]  (0 <= wcol-w <= 2)
    # so  act[h, w*C_out + co] = sum_di  x_flat[h+di, :] @ w_taps[di]
    # is exactly the 3x3 / pad=1 convolution in a lane-dense "wide" layout.
    dj = jnp.arange(KW)[:, None, None]
    wcol = jnp.arange(W + 2)[None, :, None]
    wpos = jnp.arange(W)[None, None, :]
    onehot = (wcol == wpos + dj).astype(jnp.float32)              # [3, W+2, W]
    w_taps = jnp.einsum('ocij,jkw->ikcwo', wc, onehot)            # [3, W+2, C, W, C_out]
    w_taps = w_taps.reshape(KH, K_IN, N_WIDE).astype(jnp.bfloat16)

    # Conv bias broadcast once into the (w, c_out) wide layout (hoisted).
    bias_wide = jnp.tile(bc, W).reshape(1, N_WIDE).astype(jnp.float32)

    # Classifier params, lane-padded to 128.
    wl_pad = jnp.zeros((C_out, NC_PAD), jnp.float32).at[:, :num_classes].set(wl.T)
    bl_pad = jnp.zeros((1, NC_PAD), jnp.float32).at[0, :num_classes].set(bl)

    inv_hw = 1.0 / float(H * W)

    # ------------------------------- kernel -----------------------------------
    def kernel(x_ref, wtap_ref, bias_ref, wl_ref, bl_ref, out_ref, acc_ref):
        # x_ref   : [1, H+2, (W+2)*C] bf16  whole padded image of batch b (resident over t)
        # wtap_ref: [3, (W+2)*C, N_TILE] bf16  output-column slice t of the Toeplitz weights
        # bias_ref: [1, N_TILE] f32
        # wl_ref  : [C_out, NC_PAD] f32 ; bl_ref : [1, NC_PAD] f32
        # out_ref : [1, 8, NC_PAD] f32  lane/sublane-padded logits block of batch b
        # acc_ref : [1, N_TILE] f32     pooled partial sums, accumulated over t
        t = pl.program_id(1)

        @pl.when(t == 0)
        def _init():
            acc_ref[...] = jnp.zeros_like(acc_ref)

        x_img = x_ref[0]                                           # [H+2, (W+2)*C] bf16
        # Conv for this 128-lane output tile = 3 row-shifted MXU matmuls (f32 acc).
        parts = [
            jnp.dot(x_img, wtap_ref[di], preferred_element_type=jnp.float32)
            for di in range(KH)                                    # each [H+2, N_TILE]
        ]
        act = parts[0][0:H] + parts[1][1:H + 1] + parts[2][2:H + 2]  # [H, N_TILE]
        act = jnp.maximum(act + bias_ref[...], 0.0)                # bias + ReLU (f32 VPU)
        # Global-average-pool partial sums: sublane (XLU) reduction over the H rows.
        acc_ref[...] += jnp.sum(act, axis=0, keepdims=True)

        @pl.when(t == n_tiles - 1)
        def _finalize():
            acc = acc_ref[...]                                     # [1, N_TILE]
            # Collapse the w-groups folded into the lane dim -> [1, C_out].
            feat = jnp.zeros((1, C_out), jnp.float32)
            for g in range(N_TILE // C_out):
                feat = feat + acc[:, g * C_out:(g + 1) * C_out]
            feat = feat * inv_hw                                   # mean over H*W
            featb = jnp.broadcast_to(feat, (8, C_out))
            logits = jnp.dot(featb, wl_ref[...],
                             preferred_element_type=jnp.float32) + bl_ref[...]
            out_ref[...] = logits[None]                            # [1, 8, NC_PAD]

    out = pl.pallas_call(
        kernel,
        out_shape=jax.ShapeDtypeStruct((B, 8, NC_PAD), jnp.float32),
        grid=(B, n_tiles),
        in_specs=[
            pl.BlockSpec((1, H + 2, K_IN), lambda b, t: (b, 0, 0)),   # image (resident)
            pl.BlockSpec((KH, K_IN, N_TILE), lambda b, t: (0, 0, t)),  # weight N-tile
            pl.BlockSpec((1, N_TILE), lambda b, t: (0, t)),            # bias N-tile
            pl.BlockSpec((C_out, NC_PAD), lambda b, t: (0, 0)),        # classifier W
            pl.BlockSpec((1, NC_PAD), lambda b, t: (0, 0)),            # classifier b
        ],
        out_specs=pl.BlockSpec((1, 8, NC_PAD), lambda b, t: (b, 0, 0)),
        scratch_shapes=[pltpu.VMEM((1, N_TILE), jnp.float32)],
        compiler_params=pltpu.CompilerParams(
            dimension_semantics=("parallel", "arbitrary"),
            vmem_limit_bytes=32 * 1024 * 1024),
    )(x_flat, w_taps, bias_wide, wl_pad, bl_pad)

    return out[:, 0, :num_classes]


# --------------------------------------------------------------------------
# Pure-JAX reference (mirrors the PyTorch forward) for a sanity check
# --------------------------------------------------------------------------
def reference_forward(x, wc, bc, wl, bl):
    y = jax.lax.conv_general_dilated(
        x, wc, window_strides=(1, 1), padding=((1, 1), (1, 1)),
        dimension_numbers=("NCHW", "OIHW", "NCHW"))
    y = jnp.maximum(y + bc[None, :, None, None], 0.0)
    feat = jnp.mean(y, axis=(2, 3))                # global average pool -> [B, C_out]
    return feat @ wl.T + bl[None, :]


if __name__ == "__main__":
    B, C, H, W = 2, 4, 16, 16
    C_out, num_classes = 32, 10

    key = jax.random.PRNGKey(0)
    kx, kwc, kbc, kwl, kbl = jax.random.split(key, 5)

    x = jax.random.normal(kx, (B, C, H, W), dtype=jnp.float32)
    wc = jax.random.normal(kwc, (C_out, C, 3, 3), dtype=jnp.float32) * 0.1
    bc = jax.random.normal(kbc, (C_out,), dtype=jnp.float32) * 0.1
    wl = jax.random.normal(kwl, (num_classes, C_out), dtype=jnp.float32) * 0.1
    bl = jax.random.normal(kbl, (num_classes,), dtype=jnp.float32) * 0.1

    logits = jax.block_until_ready(classifier_forward(x, wc, bc, wl, bl))
    ref = jax.block_until_ready(reference_forward(x, wc, bc, wl, bl))

    assert logits.shape == (B, num_classes)
    # bf16 MXU inputs with f32 accumulation -> slightly looser tolerance.
    assert jnp.allclose(logits, ref, rtol=2e-2, atol=2e-2), (
        float(jnp.max(jnp.abs(logits - ref))))
    print("KERNEL_OK")
</pallas_src>

<mosaic_0001>
module attributes {stable_mosaic.version = 11 : i64} {
  func.func @kernel(%arg0: i32, %arg1: i32, %arg2: memref<1x18x72xbf16, #tpu.memory_space<vmem>>, %arg3: memref<3x72x128xbf16, #tpu.memory_space<vmem>>, %arg4: memref<1x128xf32, #tpu.memory_space<vmem>>, %arg5: memref<32x128xf32, #tpu.memory_space<vmem>>, %arg6: memref<1x128xf32, #tpu.memory_space<vmem>>, %arg7: memref<1x8x128xf32, #tpu.memory_space<vmem>>, %arg8: memref<1x128xf32, #tpu.memory_space<vmem>>) attributes {dimension_semantics = [#tpu.dimension_semantics<parallel>, #tpu.dimension_semantics<arbitrary>], iteration_bounds = array<i64: 2, 4>, scalar_prefetch = 0 : i64, scratch_operands = 1 : i64, tpu.core_type = #tpu.core_type<tc>, window_params = [{transform_indices = @transform_0, window_bounds = array<i64: 1, 18, 72>}, {transform_indices = @transform_1, window_bounds = array<i64: 3, 72, 128>}, {transform_indices = @transform_2, window_bounds = array<i64: 1, 128>}, {pipeline_mode = #tpu.pipeline_mode<synchronous>, transform_indices = @transform_3, window_bounds = array<i64: 32, 128>}, {pipeline_mode = #tpu.pipeline_mode<synchronous>, transform_indices = @transform_4, window_bounds = array<i64: 1, 128>}, {transform_indices = @transform_5, window_bounds = array<i64: 1, 8, 128>}]} {
    %c0_i32 = arith.constant 0 : i32
    %0 = arith.cmpi eq, %arg1, %c0_i32 : i32
    %1 = arith.extui %0 : i1 to i32
    %c0_i32_0 = arith.constant 0 : i32
    %2 = arith.cmpi ne, %1, %c0_i32_0 : i32
    scf.if %2 {
      %cst_21 = arith.constant 0.000000e+00 : f32
      %32 = vector.broadcast %cst_21 : f32 to vector<1x128xf32>
      %c0_22 = arith.constant 0 : index
      %c0_23 = arith.constant 0 : index
      %33 = vector.load %arg8[%c0_22, %c0_23] : memref<1x128xf32, #tpu.memory_space<vmem>>, vector<1x128xf32>
      tpu.vector_store %arg8[%c0_22, %c0_23], %32 {strides = array<i32>} : memref<1x128xf32, #tpu.memory_space<vmem>>, vector<1x128xf32>,
    } else {
    }
    %c0 = arith.constant 0 : index
    %c0_1 = arith.constant 0 : index
    %c0_2 = arith.constant 0 : index
    %3 = vector.load %arg2[%c0, %c0_1, %c0_2] : memref<1x18x72xbf16, #tpu.memory_space<vmem>>, vector<1x18x72xbf16>
    %4 = vector.shape_cast %3 : vector<1x18x72xbf16> to vector<18x72xbf16>
    %c0_3 = arith.constant 0 : index
    %c0_4 = arith.constant 0 : index
    %c0_5 = arith.constant 0 : index
    %5 = vector.load %arg3[%c0_3, %c0_4, %c0_5] : memref<3x72x128xbf16, #tpu.memory_space<vmem>>, vector<1x72x128xbf16>
    %6 = vector.shape_cast %5 : vector<1x72x128xbf16> to vector<72x128xbf16>
    %cst = arith.constant dense<0.000000e+00> : vector<18x128xf32>
    %7 = tpu.matmul %4, %6, %cst {dimension_numbers = #tpu.dot_dimension_numbers<[1], [0], [0], [1], [0, 0, 1, 1], [], []>} : vector<18x72xbf16>, vector<72x128xbf16>, vector<18x128xf32> -> vector<18x128xf32>
    %c1 = arith.constant 1 : index
    %c0_6 = arith.constant 0 : index
    %c0_7 = arith.constant 0 : index
    %8 = vector.load %arg3[%c1, %c0_6, %c0_7] : memref<3x72x128xbf16, #tpu.memory_space<vmem>>, vector<1x72x128xbf16>
    %9 = vector.shape_cast %8 : vector<1x72x128xbf16> to vector<72x128xbf16>
    %cst_8 = arith.constant dense<0.000000e+00> : vector<18x128xf32>
    %10 = tpu.matmul %4, %9, %cst_8 {dimension_numbers = #tpu.dot_dimension_numbers<[1], [0], [0], [1], [0, 0, 1, 1], [], []>} : vector<18x72xbf16>, vector<72x128xbf16>, vector<18x128xf32> -> vector<18x128xf32>
    %c2 = arith.constant 2 : index
    %c0_9 = arith.constant 0 : index
    %c0_10 = arith.constant 0 : index
    %11 = vector.load %arg3[%c2, %c0_9, %c0_10] : memref<3x72x128xbf16, #tpu.memory_space<vmem>>, vector<1x72x128xbf16>
    %12 = vector.shape_cast %11 : vector<1x72x128xbf16> to vector<72x128xbf16>
    %cst_11 = arith.constant dense<0.000000e+00> : vector<18x128xf32>
    %13 = tpu.matmul %4, %12, %cst_11 {dimension_numbers = #tpu.dot_dimension_numbers<[1], [0], [0], [1], [0, 0, 1, 1], [], []>} : vector<18x72xbf16>, vector<72x128xbf16>, vector<18x128xf32> -> vector<18x128xf32>
    %14 = vector.extract_strided_slice %7 {offsets = [0, 0], sizes = [16, 128], strides = [1, 1]} : vector<18x128xf32> to vector<16x128xf32>
    %15 = vector.extract_strided_slice %10 {offsets = [1, 0], sizes = [16, 128], strides = [1, 1]} : vector<18x128xf32> to vector<16x128xf32>
    %16 = arith.addf %14, %15 : vector<16x128xf32>
    %17 = vector.extract_strided_slice %13 {offsets = [2, 0], sizes = [16, 128], strides = [1, 1]} : vector<18x128xf32> to vector<16x128xf32>
    %18 = arith.addf %16, %17 : vector<16x128xf32>
    %c0_12 = arith.constant 0 : index
    %c0_13 = arith.constant 0 : index
    %19 = vector.load %arg4[%c0_12, %c0_13] : memref<1x128xf32, #tpu.memory_space<vmem>>, vector<1x128xf32>
    %20 = vector.broadcast %19 : vector<1x128xf32> to vector<16x128xf32>
    %21 = arith.addf %18, %20 : vector<16x128xf32>
    %cst_14 = arith.constant 0.000000e+00 : f32
    %22 = vector.broadcast %cst_14 : f32 to vector<16x128xf32>
    %23 = arith.maximumf %21, %22 : vector<16x128xf32>
    %c0_15 = arith.constant 0 : index
    %c0_16 = arith.constant 0 : index
    %24 = vector.load %arg8[%c0_15, %c0_16] : memref<1x128xf32, #tpu.memory_space<vmem>>, vector<1x128xf32>
    %cst_17 = arith.constant dense<0.000000e+00> : vector<128xf32>
    %25 = vector.multi_reduction <add>, %23, %cst_17 [0] : vector<16x128xf32> to vector<128xf32>
    %26 = vector.shape_cast %25 : vector<128xf32> to vector<1x128xf32>
    %27 = arith.addf %24, %26 : vector<1x128xf32>
    %c0_18 = arith.constant 0 : index
    %c0_19 = arith.constant 0 : index
    %28 = vector.load %arg8[%c0_18, %c0_19] : memref<1x128xf32, #tpu.memory_space<vmem>>, vector<1x128xf32>
    tpu.vector_store %arg8[%c0_18, %c0_19], %27 {strides = array<i32>} : memref<1x128xf32, #tpu.memory_space<vmem>>, vector<1x128xf32>,
    %c3_i32 = arith.constant 3 : i32
    %29 = arith.cmpi eq, %arg1, %c3_i32 : i32
    %30 = arith.extui %29 : i1 to i32
    %c0_i32_20 = arith.constant 0 : i32
    %31 = arith.cmpi ne, %30, %c0_i32_20 : i32
    scf.if %31 {
      %c0_21 = arith.constant 0 : index
      %c0_22 = arith.constant 0 : index
      %32 = vector.load %arg8[%c0_21, %c0_22] : memref<1x128xf32, #tpu.memory_space<vmem>>, vector<1x128xf32>
      %cst_23 = arith.constant 0.000000e+00 : f32
      %33 = vector.broadcast %cst_23 : f32 to vector<1x32xf32>
      %34 = vector.extract_strided_slice %32 {offsets = [0, 0], sizes = [1, 32], strides = [1, 1]} : vector<1x128xf32> to vector<1x32xf32>
      %35 = arith.addf %33, %34 : vector<1x32xf32>
      %36 = vector.extract_strided_slice %32 {offsets = [0, 32], sizes = [1, 32], strides = [1, 1]} : vector<1x128xf32> to vector<1x32xf32>
      %37 = arith.addf %35, %36 : vector<1x32xf32>
      %38 = vector.extract_strided_slice %32 {offsets = [0, 64], sizes = [1, 32], strides = [1, 1]} : vector<1x128xf32> to vector<1x32xf32>
      %39 = arith.addf %37, %38 : vector<1x32xf32>
      %40 = vector.extract_strided_slice %32 {offsets = [0, 96], sizes = [1, 32], strides = [1, 1]} : vector<1x128xf32> to vector<1x32xf32>
      %41 = arith.addf %39, %40 : vector<1x32xf32>
      %cst_24 = arith.constant 3.906250e-03 : f32
      %42 = vector.broadcast %cst_24 : f32 to vector<1x32xf32>
      %43 = arith.mulf %41, %42 : vector<1x32xf32>
      %44 = vector.shape_cast %43 : vector<1x32xf32> to vector<1x32xf32>
      %45 = vector.broadcast %44 : vector<1x32xf32> to vector<8x32xf32>
      %c0_25 = arith.constant 0 : index
      %c0_26 = arith.constant 0 : index
      %46 = vector.load %arg5[%c0_25, %c0_26] : memref<32x128xf32, #tpu.memory_space<vmem>>, vector<32x128xf32>
      %cst_27 = arith.constant dense<0.000000e+00> : vector<8x128xf32>
      %47 = tpu.matmul %45, %46, %cst_27 {dimension_numbers = #tpu.dot_dimension_numbers<[1], [0], [0], [1], [0, 0, 1, 1], [], []>} : vector<8x32xf32>, vector<32x128xf32>, vector<8x128xf32> -> vector<8x128xf32>
      %c0_28 = arith.constant 0 : index
      %c0_29 = arith.constant 0 : index
      %48 = vector.load %arg6[%c0_28, %c0_29] : memref<1x128xf32, #tpu.memory_space<vmem>>, vector<1x128xf32>
      %49 = vector.broadcast %48 : vector<1x128xf32> to vector<8x128xf32>
      %50 = arith.addf %47, %49 : vector<8x128xf32>
      %51 = vector.shape_cast %50 : vector<8x128xf32> to vector<1x8x128xf32>
      %c0_30 = arith.constant 0 : index
      %c0_31 = arith.constant 0 : index
      %c0_32 = arith.constant 0 : index
      %52 = vector.load %arg7[%c0_30, %c0_31, %c0_32] : memref<1x8x128xf32, #tpu.memory_space<vmem>>, vector<1x8x128xf32>
      tpu.vector_store %arg7[%c0_30, %c0_31, %c0_32], %51 {strides = array<i32>} : memref<1x8x128xf32, #tpu.memory_space<vmem>>, vector<1x8x128xf32>,
    } else {
    }
    return
  }
  func.func @transform_0(%arg0: i32, %arg1: i32) -> (i32, i32, i32) {
    %c0_i32 = arith.constant 0 : i32
    %c0_i32_0 = arith.constant 0 : i32
    %c0_i32_1 = arith.constant 0 : i32
    return %arg0, %c0_i32, %c0_i32_0 : i32, i32, i32
  }
  func.func @transform_1(%arg0: i32, %arg1: i32) -> (i32, i32, i32) {
    %c0_i32 = arith.constant 0 : i32
    %c0_i32_0 = arith.constant 0 : i32
    %c0_i32_1 = arith.constant 0 : i32
    return %c0_i32, %c0_i32_0, %arg1 : i32, i32, i32
  }
  func.func @transform_2(%arg0: i32, %arg1: i32) -> (i32, i32) {
    %c0_i32 = arith.constant 0 : i32
    %c0_i32_0 = arith.constant 0 : i32
    return %c0_i32, %arg1 : i32, i32
  }
  func.func @transform_3(%arg0: i32, %arg1: i32) -> (i32, i32) {
    %c0_i32 = arith.constant 0 : i32
    %c0_i32_0 = arith.constant 0 : i32
    %c0_i32_1 = arith.constant 0 : i32
    return %c0_i32, %c0_i32_0 : i32, i32
  }
  func.func @transform_4(%arg0: i32, %arg1: i32) -> (i32, i32) {
    %c0_i32 = arith.constant 0 : i32
    %c0_i32_0 = arith.constant 0 : i32
    %c0_i32_1 = arith.constant 0 : i32
    return %c0_i32, %c0_i32_0 : i32, i32
  }
  func.func @transform_5(%arg0: i32, %arg1: i32) -> (i32, i32, i32) {
    %c0_i32 = arith.constant 0 : i32
    %c0_i32_0 = arith.constant 0 : i32
    %c0_i32_1 = arith.constant 0 : i32
    return %arg0, %c0_i32, %c0_i32_0 : i32, i32, i32
  }
}

</mosaic_0001>

<bundles_post_ra>
// kernel: tpu_custom_call.1
= control target key start
LH: loop header
LB: loop body
LE: loop exit
PB: predicated region body
PF: predicated region fallthrough
CT: control target
= control target key end

     0   :  { %10 = vsyncpa [#allocation4], 0  ;;  %s1613_s0 = inlined_call_operand.vmem [shape: bf16[2,18,72], index: 0, kind: input, shape index: {}]   ;;  %s1614_s1 = inlined_call_operand.hbm [shape: bf16[3,72,512], index: 1, kind: input, shape index: {}]   ;;  %s1615_s2 = inlined_call_operand.vmem [shape: f32[1,512], index: 2, kind: input, shape index: {}]   ;;  %s1616_s3 = inlined_call_operand.vmem [shape: f32[32,128], index: 3, kind: input, shape index: {}]   ;;  %s1617_s4 = inlined_call_operand.vmem [shape: f32[1,128], index: 4, kind: input, shape index: {}]   ;;  %s1618_s5 = inlined_call_operand.hbm [shape: f32[2,8,128], index: 5, kind: output, shape index: {}]  }
   0x1   :  { %12 = vsyncpa [#allocation4 + $0x1], 0 }
   0x2   :  { %13 = vsyncpa [#allocation5], 0 }
   0x3   :  { %15 = vsyncpa [#allocation5 + $0x1], 0  ;;  %s1322_s18 = smov 0   ;;  %s1324_s19 = smov 0  }
   0x4   :  { %s1326_s20 = smov 0   ;;  %s1328_s21 = smov 0  }
   0x5   :  { %s1330_s22 = smov 0   ;;  %s1332_s23 = smov 0  }
   0x6   :  { %s1334_s24 = smov 0   ;;  %s1336_s25 = smov 0  }
   0x7   :  { %s1338_s26 = smov 0   ;;  %s1340_s27 = smov 0  }
   0x8   :  { %s1342_s28 = smov 0  }
   0x9 LB: > { %1624 = sst [smem:[#allocation9_spill]] %s1270_s26  ;;  %s848_s29 = sadd.s32 4294967295, %s1278_s28   ;;  %s1278_s28 = sphi %s1342_s28, %s21_s28   ;;  %s1274_s27 = sphi %s1340_s27, %s1639_s27   ;;  %s1270_s26 = sphi %s1338_s26, %s1638_s26   ;;  %s1266_s25 = sphi %s1336_s25, %s1637_s25   ;;  %s1262_s24 = sphi %s1334_s24, %s1636_s24   ;;  %s1258_s23 = sphi %s1332_s23, %s1645_s23   ;;  %s1254_s22 = sphi %s1330_s22, %s1644_s22   ;;  %s1250_s21 = sphi %s1328_s21, %s1643_s21   ;;  %s1246_s20 = sphi %s1326_s20, %s1642_s20   ;;  %s1242_s19 = sphi %s1324_s19, %s1641_s19   ;;  %s1238_s18 = sphi %s1322_s18, %s1640_s18  }
   0xa   : > { %1625 = sst [smem:[#allocation10_spill]] %s1274_s27  ;;  %s849_s30 = sadd.s32 4294967294, %s1278_s28  }
   0xb   : > { %s30_s6 = sadd.s32 1, %s1270_s26  ;;  %s33_s7 = sadd.s32 1, %s1274_s27 }
   0xc   : > { %p31_p0 = scmp.ge.s32.totalorder %s30_s6, 4  ;;  %s66_s8 = sadd.s32 1, %s1258_s23 }
   0xd   : > { %p73_p1 = scmp.ne.s32.totalorder %s1258_s23, %s1254_s22  ;;  %p74_p2 = scmp.eq.s32.totalorder %s1278_s28, 0 }
   0xe   : > { %s1647_s6 = smov (%p31_p0, %s30_s6), 0  ;;  %s1649_s7 = smov (!%p31_p0, %s33_s7), %s1274_s27 }
   0xf   : > { %1626 = sst [smem:[#allocation11_spill]] %s1647_s6  ;;  %s63_s9 = ssub.s32 %s1270_s26, %s1647_s6 }
  0x10   : > { %p1388_p3 = por %p74_p2, %p73_p1  ;;  %p35_p4 = scmp.ge.s32.totalorder %s1649_s7, 2 }
  0x11   : > { %p64_p5 = scmp.eq.s32.totalorder %s63_s9, 0  ;;  %p79_p6 = scmp.ne.s32.totalorder %s1254_s22, %s1250_s21 }
  0x12   : > { %p80_p7 = scmp.eq.s32.totalorder %s848_s29, 0  ;;  %s1651_s7 = smov (%p35_p4, %s1649_s7), 0 }
  0x13   : > { %1628 = sst [smem:[#allocation12_spill]] %s1651_s7  ;;  %s157_s13 = ssub.s32 %s1274_s27, %s1651_s7 }
  0x14   : > { %s1396_s11 = scalar_select %p64_p5, %s1258_s23, %s66_s8  }
  0x15   : > { %p1398_p8 = por %p80_p7, %p79_p6  ;;  %p158_p9 = scmp.eq.s32.totalorder %s157_s13, 0 }
  0x16   : > { %s160_s14 = sadd.s32 1, %s1246_s20  ;;  %p170_p10 = scmp.ne.s32.totalorder %s1246_s20, %s1242_s19 }
  0x17   : > { %p171_p11 = scmp.eq.s32.totalorder %s848_s29, 7  ;;  %p176_p13 = scmp.ne.s32.totalorder %s1242_s19, %s1238_s18 }
  0x18   : > { %s1408_s15 = scalar_select %p158_p9, %s1246_s20, %s160_s14  }
  0x19   : > { %p1410_p12 = por %p171_p11, %p170_p10  ;;  %p177_p0 = scmp.eq.s32.totalorder %s849_s30, 7 }
  0x1a   : > { %p1009_p1 = scmp.lt.s32.totalorder %s1278_s28, 8  ;;  %s211_s17 = sand.u32 1, %s1258_s23  }
  0x1b   : > { %s1630_s16 = scalar_select %p1410_p12, 1, 0 }
  0x1c   : > { %p1418_p2 = por %p177_p0, %p176_p13  ;;  %s994_s8 = smul.u32 108, %s211_s17 }
  0x1d   : > { %s852_s9 = sshll.u32 %s1270_s26, 6  ;;  %p1430_p4 = pnand %p1009_p1, %p1388_p3 }
  0x1e   : > { %s1631_s21 = scalar_select %p1418_p2, 1, 0 }
  0x1f   : > { %s1426_s29 = scalar_lea.hbm %s1614_s1, %s852_s9  ;;  %s215_s14 = scalar_lea.vmem [#allocation3], %s994_s8 }
  0x20   : > { %s221_s6 = sshll.u32 %s215_s14, 4  ;;  %s1437_s27 = scalar_lea.sflag [#allocation4], %s211_s17  ;;  %s1434_s6 = int_to_ptr.vmem [resolvable:$true] %s221_s6 }
  0x21   : > { %s1126_s7 = scalar_lea.hbm %s1426_s29, 1728  ;;  %p1128_p7 = pneg %p1430_p4 }
  0x22   : > { %p1127_p6 = scmp.ne.s32.totalorder %s1426_s29, %s1126_s7  ;;  %s1131_s13 = scalar_lea.hbm %s1614_s1, 6912 }
  0x23   : > { %p1132_p10 = scmp.lt.u32.totalorder %s1426_s29, %s1614_s1  ;;  %p1133_p11 = scmp.lt.u32.totalorder %s1131_s13, %s1126_s7 }
  0x24   : > { %p1129_p9 = pnand %p1128_p7, %p1127_p6  ;;  %p1135_p0 = scmp.lt.u32.totalorder %s1126_s7, %s1426_s29 }
  0x25   : > { %p1134_p13 = por %p1133_p11, %p1132_p10 }
  0x26   : > { %p1130_p3 = pneg %p1129_p9 }
  0x27   : > { %p1136_p1 = por %p1135_p0, %p1134_p13 }
  0x29   : > { %p1137_p5 = pnand %p1136_p1, %p1130_p3 }
  0x2b   : > { %1140 = shalt.err (!%p1137_p5)
}
  0x2c   : > { %s1141_s17 = scalar_lea.vmem %s1434_s6, 1728  ;;  %s1280_s14 = smov [#allocation3]  }
  0x2d   : > { %p1142_p6 = scmp.ne.s32.totalorder %s1434_s6, %s1141_s17  ;;  %s1146_s10 = sshll.u32 %s1280_s14, 4  ;;  %s1147_s10 = int_to_ptr.vmem [resolvable:$false] %s1146_s10 }
  0x2e   : > { %s1148_s26 = scalar_lea.vmem %s1147_s10, 3456  ;;  %p1149_p12 = scmp.lt.s32.totalorder %s1434_s6, %s1147_s10 }
  0x2f   : > { %p1144_p9 = pnand %p1142_p6, %p1128_p7  ;;  %p1150_p10 = scmp.lt.s32.totalorder %s1148_s26, %s1141_s17 }
  0x31   : > { %p1145_p2 = pneg %p1144_p9  ;;  %p1151_p11 = por %p1150_p10, %p1149_p12 }
  0x33   : > { %p1152_p13 = pnand %p1151_p11, %p1145_p2 }
  0x35   : > { %1155 = shalt.err (!%p1152_p13)
}
  0x36   : > { %s1281_s7 = smov 256   ;;  %s1282_s9 = smov 64  }
  0x37   : > { %s1283_s13 = smov 4   ;;  %p235_p5 = scmp.lt.s32.totalorder %s1278_s28, 9 }
  0x38   : > { %1004 = dma.hbm_to_vmem [thread:$0]  (!%p1430_p4), %s1426_s29, 1728, %s1434_s6, %s1437_s27, %s1281_s7, %s1282_s9, %s1283_s13  }
  0x39   : > { %p1633_p7 = scmp.ge.s32.totalorder %s1278_s28, 1 }
  0x3b   : > { %p236_p3 = pnand %p1633_p7, %p235_p5 }
  0x3c   : > { %s241_s8 = sand.u32 (!%p236_p3), 1, %s1254_s22  }
  0x3d   : > { %239 = sbr.rel (%p236_p3) target bundleno = 739 (0x2e3), region = 40  ;;  %s242_s14 = scalar_lea.sflag (!%p236_p3), [#allocation4], %s241_s8 }
  0x3e   : > { %s995_s17 = smul.u32 (!%p236_p3), 108, %s241_s8 }
  0x40   : > { %s1469_s10 = scalar_lea.vmem (!%p236_p3), [#allocation3], %s995_s17 }
  0x44   : > { %1229 = dma.done.wait (%p1398_p8), %s242_s14, 1728  }
  0x45   : > { %1231 = vsyncadd (%p1398_p8), %s242_s14, 4294965568  ;;  %s277_s27 = sand.u32 1, %s1242_s19   ;;  %p280_p12 = scmp.lt.s32.totalorder %s1266_s25, 1 }
  0x46   : > { %s1479_s6 = sshll.u32 %s277_s27, 3  ;;  %p285_p2 = scmp.lt.s32.totalorder %s1262_s24, 3 }
  0x47   : > { %s281_s29 = scalar_select %p280_p12, %s1266_s25, 1 }
  0x48   : > { %s1484_s30 = scalar_select %p285_p2, %s1262_s24, 3 }
  0x49   : > { %s996_s26 = smul.u32 12, %s281_s29  ;;  %s279_s14 = scalar_lea.vmem [#allocation6], %s1479_s6 }
  0x4a   : > { %s287_s9 = scalar_lea.vmem %s1615_s2, %s1484_s30  ;;  %p856_p8 = scmp.ne.s32.totalorder %s1262_s24, 0 }
  0x4b   : > { %s1493_s17 = scalar_lea.vmem %s1613_s0, %s996_s26  ;;  %v1284_v0 = vmov (!%p856_p8), 0.0  }
  0x4c   : > { %292 = sbr.rel (%p856_p8) target bundleno = 83 (0x53), region = 48  ;;  %293 = vst [vmem:[#allocation2] sm:$0x1] (!%p856_p8), %v1284_v0 }
  0x53 PF: > { %v1109_v1 = vld [vmem:[%s1469_s10] sm:$0xff]   ;;  %v1111_v3 = vld [vmem:[%s1469_s10 + $0x8] sm:$0xff]   ;;  %v1113_v5 = vld [vmem:[%s1469_s10 + $0x10] sm:$0xff]   ;;  %vm341_vm0 = vcmask 588800   ;;  %vm348_vm1 = vcmask 1043456   ;;  %vm578_vm2 = vcmask 1046528  }
  0x54   : > { %v1110_v2 = vld [vmem:[%s1469_s10 + $0x24] sm:$0xff]   ;;  %932 = vmatprep.subr.bf16.mxu0 %v1109_v1  ;;  %v1112_v4 = vld [vmem:[%s1469_s10 + $0x2c] sm:$0xff]   ;;  %v1114_v6 = vld [vmem:[%s1469_s10 + $0x34] sm:$0xff]   ;;  %vm591_vm3 = vcmask 1045504   ;;  %p899_p4 = scmp.ne.s32.totalorder %s1262_s24, 3 }
  0x55   : > { %946 = vmatprep.subr.bf16.mxu1 %v1110_v2  ;;  %933 = vmatpush3.bf16.msra.mxu0 %v1109_v1  ;;  %v1115_v7 = vld [vmem:[%s1469_s10 + $0x18] sm:$0xff]   ;;  %v1117_v10 = vld [vmem:[%s1469_s10 + $0x20] ss:$0 sps:$4 sm:$0xff]   ;;  %v1118_v11 = vld [vmem:[%s1469_s10 + $0x44] ss:$0 sps:$4 sm:$0xff]   ;;  %s1285_s12 = smov (!%p899_p4), 96  }
  0x56   : > { %947 = vmatpush3.bf16.msra.mxu1 %v1110_v2  ;;  %934 = vmatprep.subr.bf16.mxu0 %v1111_v3  ;;  %v1116_v8 = vld [vmem:[%s1469_s10 + $0x3c] sm:$0xff]   ;;  %v350_v12 = vsel %vm348_vm1, %v1117_v10, 0  ;;  %v1121_v13 = vld [vmem:[%s1469_s10 + $0x48] sm:$0xff]   ;;  %v437_v14 = vsel %vm348_vm1, %v1118_v11, 0  ;;  %v1122_v16 = vld [vmem:[%s1469_s10 + $0x50] sm:$0xff]   ;;  %v1286_v63 = vmov (!%p899_p4), 0.0|0.0  }
  0x57   : > { %948 = vmatprep.subr.bf16.mxu1 %v1112_v4  ;;  %v1119_v9 = vld [vmem:[%s1493_s17] sm:$0xff]   ;;  %v1120_v15 = vld [vmem:[%s1493_s17 + $0x8] ss:$0 sps:$4 sm:$0x11]   ;;  %v1125_v19 = vld [vmem:[%s1469_s10 + $0x68] ss:$0 sps:$4 sm:$0xff]  }
  0x58   : > { %942 = vmatprep.mubr.msk.bf16.mxu0 %vm341_vm0, %v1119_v9  ;;  %956 = vmatprep.mubr.msk.bf16.mxu1 %vm341_vm0, %v1119_v9  ;;  %v1123_v17 = vld [vmem:[%s1469_s10 + $0x58] sm:$0xff]   ;;  %v1124_v18 = vld [vmem:[%s1469_s10 + $0x60] sm:$0xff]   ;;  %v525_v20 = vsel %vm348_vm1, %v1125_v19, 0  ;;  %s1287_s10 = smov (!%p899_p4), 32   ;;  %vm1288_vm4 = vmmov (!%p899_p4), 0   ;;  %s1290_s29 = smov (!%p899_p4), 64  }
  0x59   : > { %935 = vmatpush3.bf16.msra.mxu0 %v1111_v3  ;;  %v898_v45 = vld [vmem:[%s287_s9] ss:$0 sm:$0xff]  ;;  %v648_v0 = vld [vmem:[%s1616_s3 + $0x8] sm:$0xff] (!%p899_p4)  ;;  %v649_v1 = vld [vmem:[%s1616_s3 + $0x10] sm:$0xff] (!%p899_p4)  ;;  %vm658_vm5 = vcmask (!%p899_p4), 261120  }
  0x5a   : > { %949 = vmatpush3.bf16.msra.mxu1 %v1112_v4  ;;  %936 = vmatprep.subr.bf16.mxu0 %v1113_v5  ;;  %v612_v58 = vld [vmem:[#allocation2] sm:$0x1]  ;;  %v650_v2 = vld [vmem:[%s1616_s3 + $0x18] sm:$0xff] (!%p899_p4)  ;;  %v1289_v4 = vmov (!%p899_p4), 0.0  }
  0x5b   : > { %950 = vmatprep.subr.bf16.mxu1 %v1114_v6  ;;  %v647_v62 = vld [vmem:[%s1616_s3] sm:$0xff] (!%p899_p4) }
  0x5c   : > { %v986_v3 = vpack.c.bf16 (!%p899_p4), %v648_v0, %v647_v62 }
  0x5d   : > { %937 = vmatpush3.bf16.msra.mxu0 %v1113_v5  ;;  %v989_v5 = vpack.c.bf16 (!%p899_p4), %v650_v2, %v649_v1 }
  0x5e   : > { %951 = vmatpush3.bf16.msra.mxu1 %v1114_v6  ;;  %938 = vmatprep.subr.bf16.mxu0 %v1115_v7  ;;  %v643_v6 = vlaneseq (!%p899_p4) }
  0x5f   : > { %952 = vmatprep.subr.bf16.mxu1 %v1116_v8 }
  0x61   : > { %939 = vmatpush3.bf16.msra.mxu0 %v1115_v7 }
  0x62   : > { %953 = vmatpush3.bf16.msra.mxu1 %v1116_v8  ;;  %991 = vmatprep.subr.msk.bf16.mxu0 %vm348_vm1, %v1117_v10 }
  0x63   : > { %992 = vmatprep.subr.msk.bf16.mxu1 %vm348_vm1, %v1118_v11 }
  0x65   : > { %941 = vmatpush3.bf16.msra.mxu0 %v350_v12 }
  0x66   : > { %955 = vmatpush3.bf16.msra.mxu1 %v437_v14  ;;  %960 = vmatprep.subr.bf16.mxu0 %v1121_v13 }
  0x68   : > { %943 = vmatmul.mubr.msk.bf16.vlgmr.msra.gmra.mrb[0].mxu0 %vm341_vm0, %v1120_v15 }
  0x69   : > { %957 = vmatmul.mubr.msk.bf16.vlgmr.msra.gmra.mrb[0].mxu1 %vm341_vm0, %v1120_v15  ;;  %961 = vmatpush3.bf16.msra.mxu0 %v1121_v13 }
  0x6a   : > { %962 = vmatprep.subr.bf16.mxu0 %v1122_v16  ;;  %970 = vmatprep.mubr.msk.bf16.mxu0 %vm341_vm0, %v1119_v9  ;;  %v644_v9 = vshrl.u32 (!%p899_p4), %v643_v6, 7 }
  0x6c   : > { %v645_v13 = vsub.s32 (!%p899_p4), 0, %v644_v9 }
  0x6d   : > { %963 = vmatpush3.bf16.msra.mxu0 %v1122_v16 }
  0x6e   : > { %964 = vmatprep.subr.bf16.mxu0 %v1123_v17 }
  0x71   : > { %965 = vmatpush3.bf16.msra.mxu0 %v1123_v17  ;;  %v900_v17 = vld [vmem:[%s1617_s4] ss:$0 sm:$0xff] (!%p899_p4) }
  0x72   : > { %966 = vmatprep.subr.bf16.mxu0 %v1124_v18 }
  0x75   : > { %967 = vmatpush3.bf16.msra.mxu0 %v1124_v18 }
  0x76   : > { %993 = vmatprep.subr.msk.bf16.mxu0 %vm348_vm1, %v1125_v19 }
  0x79   : > { %969 = vmatpush3.bf16.msra.mxu0 %v525_v20 }
  0x7a   : > { %985 = vmatprep.subr.bf16.mxu0 (!%p899_p4), %v1286_v63 }
  0x7c   : > { %971 = vmatmul.mubr.msk.bf16.vlgmr.msra.gmra.mrb[4].mxu0 %vm341_vm0, %v1120_v15 }
  0x7d   : > { %982 = vmatprep.mubr.msk.f32.mxu0 (!%p899_p4), %vm1288_vm4, %v1289_v4  ;;  %987 = vmatpush3.bf16.msra.mxu0 (!%p899_p4), %v986_v3 }
  0x7e   : > { %988 = vmatprep.subr.bf16.mxu0 (!%p899_p4), %v1286_v63 }
  0x81   : > { %990 = vmatpush3.bf16.msra.mxu0 (!%p899_p4), %v989_v5 }
 0x13b   : > { %v944_v21 = vpop.f32.mrb[0].mxu0 }
 0x13c   : > { %v958_v22 = vpop.f32.mrb[0].mxu1  ;;  %v386_v23 = vpop.f32.mrb[1].mxu0 }
 0x13d   : > { %v473_v24 = vpop.f32.mrb[1].mxu1  ;;  %v945_v25 = vpop.f32.mrb[2].mxu0  ;;  %v582_v26 = vrot.slane %v958_v22, 1 }
 0x13e   : > { %v579_v27 = vrot.slane %v473_v24, 1  ;;  %v959_v28 = vpop.f32.mrb[2].mxu1  ;;  %v389_v29 = vpop.f32.mrb[3].mxu0 }
 0x13f   : > { %v476_v30 = vpop.f32.mrb[3].mxu1 }
 0x140   : > { %v580_v31 = vrot.slane %v476_v30, 1 }
 0x142   : > { %v581_v32 = vsel %vm578_vm2, %v579_v27, %v580_v31  ;;  %v583_v33 = vsel %vm578_vm2, %v580_v31, %v582_v26 }
 0x143   : > { %v586_v34 = vadd.f32 %v581_v32, %v386_v23  ;;  %v587_v35 = vadd.f32 %v583_v33, %v389_v29 }
 0x14f   : > { %v972_v36 = vpop.f32.mrb[4].mxu0 }
 0x150   : > { %v561_v37 = vpop.f32.mrb[5].mxu0  ;;  %v595_v40 = vrot.slane %v972_v36, 2 }
 0x151   : > { %v973_v38 = vpop.f32.mrb[6].mxu0  ;;  %v592_v41 = vrot.slane %v561_v37, 2 }
 0x152   : > { %v564_v39 = vpop.f32.mrb[7].mxu0 }
 0x153   : > { %v593_v42 = vrot.slane %v564_v39, 2 }
 0x155   : > { %v594_v43 = vsel %vm591_vm3, %v592_v41, %v593_v42  ;;  %v596_v44 = vsel %vm591_vm3, %v593_v42, %v595_v40 }
 0x156   : > { %v599_v46 = vadd.f32 %v594_v43, %v586_v34  ;;  %v600_v47 = vadd.f32 %v596_v44, %v587_v35 }
 0x158   : > { %v608_v48 = vadd.f32 %v898_v45, %v599_v46  ;;  %v609_v49 = vadd.f32 %v898_v45, %v600_v47 }
 0x15a   : > { %v610_v50 = vmax.f32 %v608_v48, 0.0  ;;  %v611_v51 = vmax.f32 %v609_v49, 0.0 }
 0x15c   : > { %v613_v52 = vadd.f32 %v611_v51, %v610_v50 }
 0x15e   : > { %v614_v53 = vrot.slane %v613_v52, 4 }
 0x160   : > { %v615_v54 = vadd.f32 %v614_v53, %v613_v52 }
 0x162   : > { %v616_v55 = vrot.slane %v615_v54, 2 }
 0x164   : > { %v617_v56 = vadd.f32 %v616_v55, %v615_v54 }
 0x166   : > { %v618_v57 = vrot.slane %v617_v56, 1  ;;  %625 = sbr.rel (%p899_p4) target bundleno = 714 (0x2ca), region = 52 }
 0x168   : > { %v619_v59 = vadd.f32 %v618_v57, %v617_v56 }
 0x16a   : > { %v620_v60 = vadd.f32 %v619_v59, %v612_v58 }
 0x16c   : > { %621 = vst [vmem:[#allocation2] sm:$0x1] %v620_v60 }
 0x173   : > { %v626_v61 = vld [vmem:[#allocation2] sm:$0x1] }
 0x174   : > { %629 = vrot.lane.b32.xlu0 %v626_v61, %s1285_s12  ;;  %637 = vrot.lane.b32.xlu1 %v626_v61, %s1287_s10 }
 0x178   : > { %633 = vrot.lane.b32.xlu0 %v626_v61, %s1290_s29 }
 0x1e6   : > { %v630_v7 = vpop.permute.xlu0 %629  ;;  %v638_v11 = vpop.permute.xlu1 %637 }
 0x1e7   : > { %v632_v8 = vadd.f32 %v630_v7, %v626_v61 }
 0x1ea   : > { %v634_v10 = vpop.permute.xlu0 %633 }
 0x1eb   : > { %v636_v12 = vadd.f32 %v634_v10, %v632_v8 }
 0x1ed   : > { %v640_v14 = vadd.f32 %v638_v11, %v636_v12 }
 0x1ef   : > { %v641_v15 = vmul.f32 0.00390625, %v640_v14 }
 0x1f1   : > { %v646_v16 = vrot.slane %v641_v15, %v645_v13 }
 0x1f3   : > { %983 = vmatmul.mubr.msk.f32.vlgmr.msra.gmra.mrb[0].mxu0 %vm658_vm5, %v646_v16 }
 0x2c6   : > { %v727_v18 = vpop.f32.mrb[0].mxu0 }
 0x2c7   : > { %v728_v19 = vadd.f32 %v900_v17, %v727_v18  ;;  %v984_v20 = vpop.f32.mrb[1].mxu0 }
 0x2c9   : > { %731 = vst [vmem:[%s279_s14] sm:$0xff] %v728_v19 }
 0x2ca PF: > { %s903_s12 = sshll.u32 %s1266_s25, 7  ;;  %s746_s8 = sshll.u32 %s279_s14, 4  ;;  %s747_s8 = int_to_ptr.vmem [resolvable:$true] %s746_s8 }
 0x2cb   : > { %s1553_s13 = scalar_lea.hbm %s1618_s5, %s903_s12  ;;  %s733_s17 = scalar_lea.sflag [#allocation5], %s277_s27 }
 0x2cc   : > { %s1156_s24 = scalar_lea.vmem %s747_s8, 128  ;;  %p1634_p1 = scmp.ne.s32.totalorder %s1630_s16, 0 }
 0x2cd   : > { %p1157_p0 = scmp.ne.s32.totalorder %s747_s8, %s1156_s24  ;;  %s1291_s10 = smov [#allocation6]  }
 0x2ce   : > { %s1160_s29 = sshll.u32 %s1291_s10, 4  ;;  %s1161_s29 = int_to_ptr.vmem [resolvable:$false] %s1160_s29 }
 0x2cf   : > { %p1158_p6 = pnand %p1157_p0, %p1634_p1  ;;  %s1162_s30 = scalar_lea.vmem %s1161_s29, 256 }
 0x2d0   : > { %p1163_p10 = scmp.lt.s32.totalorder %s747_s8, %s1161_s29  ;;  %p1164_p11 = scmp.lt.s32.totalorder %s1162_s30, %s1156_s24 }
 0x2d1   : > { %p1159_p9 = pneg %p1158_p6 }
 0x2d2   : > { %p1165_p13 = por %p1164_p11, %p1163_p10 }
 0x2d4   : > { %p1166_p5 = pnand %p1165_p13, %p1159_p9 }
 0x2d6   : > { %1169 = shalt.err (!%p1166_p5)
}
 0x2d7   : > { %s1170_s25 = scalar_lea.hbm %s1553_s13, 128  ;;  %s1174_s14 = scalar_lea.hbm %s1618_s5, 256 }
 0x2d8   : > { %p1171_p7 = scmp.ne.s32.totalorder %s1553_s13, %s1170_s25  ;;  %p1175_p2 = scmp.lt.u32.totalorder %s1553_s13, %s1618_s5 }
 0x2d9   : > { %p1176_p8 = scmp.lt.u32.totalorder %s1174_s14, %s1170_s25  ;;  %p1178_p0 = scmp.lt.u32.totalorder %s1170_s25, %s1553_s13 }
 0x2da   : > { %p1172_p3 = pnand %p1171_p7, %p1634_p1 }
 0x2db   : > { %p1177_p4 = por %p1176_p8, %p1175_p2 }
 0x2dc   : > { %p1173_p12 = pneg %p1172_p3 }
 0x2dd   : > { %p1179_p6 = por %p1178_p0, %p1177_p4 }
 0x2df   : > { %p1180_p9 = pnand %p1179_p6, %p1173_p12 }
 0x2e1   : > { %1183 = shalt.err (!%p1180_p9)
}
 0x2e2   : > { %999 = dma.vmem_to_hbm [thread:$0]  (%p1634_p1), %s747_s8, 128, %s1553_s13, %s733_s17  }
 0x2e3 PF: > { %p1010_p10 = scmp.ge.s32.totalorder %s1278_s28, 2  ;;  %s758_s7 = sand.u32 1, %s1238_s18  }
 0x2e4   : > { %p1635_p11 = scmp.ne.s32.totalorder %s1631_s21, 0  ;;  %s759_s9 = scalar_lea.sflag [#allocation5], %s758_s7 }
 0x2e6   : > { %p1006_p13 = pnand %p1010_p10, %p1635_p11 }
 0x2e8   : > { %1233 = dma.done.wait (!%p1006_p13), %s759_s9, 128  }
 0x2e9   : > { %1235 = vsyncadd (!%p1006_p13), %s759_s9, 4294967168  ;;  %s21_s28 = sadd.s32 1, %s1278_s28   ;;  %s1636_s24 = sld [smem:[#allocation9_spill]] }
 0x2ea   : > { %p18_p5 = scmp.ge.s32.totalorder %s21_s28, 10   ;;  %s1637_s25 = sld [smem:[#allocation10_spill]] }
 0x2eb   : > { %s1638_s26 = sld [smem:[#allocation11_spill]]  ;;  %s1639_s27 = sld [smem:[#allocation12_spill]] }
 0x2ec   : > { %s1640_s18 = smov %s1242_s19  ;;  %s1641_s19 = smov %s1246_s20 }
 0x2ed   : > { %s1642_s20 = smov %s1408_s15  ;;  %s1643_s21 = smov %s1254_s22 }
 0x2ee   : > { %s1644_s22 = smov %s1258_s23  ;;  %s1645_s23 = smov %s1396_s11 }
 0x2ef   :  { %20 = sbr.rel (!%p18_p5) target bundleno = 9 (0x9), region = 101 }
 0x2f6   :  { %764 = vsyncpa [#allocation4], 1 }
 0x2f7   :  { %766 = vsyncpa [#allocation4 + $0x1], 1 }
 0x2f8   :  { %767 = vsyncpa [#allocation5], 1 }
 0x2f9   :  { %769 = vsyncpa [#allocation5 + $0x1], 1 }

</bundles_post_ra>
